<compile_context>
chip_gen: v6e
topology: v6e:2x2x1
jax: 0.10.0
libtpu: 0.0.40
codegen_flags: <defaults>
</compile_context>

<pallas_src>
import functools

import numpy as np
import jax
import jax.numpy as jnp
from jax.experimental import pallas as pl
from jax.experimental.pallas import tpu as pltpu

_LANES = 128


def _tpu_config():
    """Returns (num_core_splits, vmem_limit_bytes, tile_budget_bytes)."""
    kind = ""
    try:
        kind = jax.devices()[0].device_kind.lower()
    except Exception:
        pass
    # v5e / v6e: single TensorCore, 128 MiB physical VMEM -> big blocks.
    if ("v5e" in kind) or ("v5 lite" in kind) or ("v5lite" in kind) or ("v6" in kind):
        return 1, 64 * 1024 * 1024, 48 * 1024 * 1024
    # v7x: 2 TensorCores/chip, only 64 MiB VMEM per TC -> conservative budget.
    if ("v7" in kind) or ("tpu7" in kind):
        return 2, 44 * 1024 * 1024, 26 * 1024 * 1024
    # v4 / v5p (2-TC megacore) and unknown chips: 2-way split where it exists,
    # VMEM budget kept at the v7x-safe level.
    two_core = ("v4" in kind) or ("v5p" in kind)
    return (2 if two_core else 1), 44 * 1024 * 1024, 26 * 1024 * 1024


def _pick_n_tile(n_per_split, d, g_pad, tile_budget_bytes):
    """Largest row tile whose in-flight VMEM footprint fits the budget."""
    # Per-row VMEM bytes while one tile is in flight:
    #   pred+gt blocks, double-buffered:          2 inputs * 2 bufs * 4*d
    #   f32 elementwise intermediates:            ~3 * 4*d  (diff / sq / masked sq)
    #   (G_pad, NT) f32 membership mask + slop:   ~5 * g_pad
    #   lane-dense dom row (8-sublane padded), double-buffered: 2 * 32
    bytes_per_row = (2 * 2 + 3) * 4 * d + 5 * g_pad + 64
    rows = int(tile_budget_bytes // max(bytes_per_row, 1))
    if rows >= 256:
        rows = (rows // 256) * 256
    else:
        rows = max(8, (rows // 8) * 8)
    want = -(-max(n_per_split, 1) // 8) * 8      # never larger than the data needs
    return int(max(8, min(rows, want)))


def _group_sq_sum_kernel(dom_ref, grp_ref, pred_ref, gt_ref, acc_ref,
                         *, n_rows, n_tile, inner_blocks, mask_tail):
    """Accumulate per-group sums of squared error, partially reduced over D.

    dom_ref  : (1, NT)     int32   domain id per sample (lane-dense row)
    grp_ref  : (G_pad, 1)  int32   unique group ids (column)
    pred_ref : (NT, D)     float
    gt_ref   : (NT, D)     float
    acc_ref  : (G_pad, D)  float32 output accumulator, resident across axis 1
    """
    pi = pl.program_id(0)
    j = pl.program_id(1)

    @pl.when(j == 0)
    def _init():
        acc_ref[...] = jnp.zeros_like(acc_ref)

    nt, d = pred_ref.shape
    diff = pred_ref[...].astype(jnp.float32) - gt_ref[...].astype(jnp.float32)
    sq = diff * diff                                               # (NT, D)  VPU

    if mask_tail:
        # pred/gt are NOT padded: rows at/after the true N hold undefined data
        # (possibly NaN/Inf).  Zero them BEFORE the matmul so 0*NaN never
        # reaches the MXU accumulation.  `mask_tail` is a trace-time bool, so
        # exactly-covered inputs pay nothing.
        row0 = (pi * inner_blocks + j) * n_tile
        rows = row0 + jax.lax.broadcasted_iota(jnp.int32, (nt, d), 0)
        sq = jnp.where(rows < n_rows, sq, jnp.float32(0.0))

    # Group-membership mask (G_pad, NT): column-broadcast grp vs lane-dense dom
    # row -- two cheap broadcasts, no relayout/transpose.
    mask = jnp.where(grp_ref[...] == dom_ref[...],
                     jnp.float32(1.0), jnp.float32(0.0))           # (G_pad, NT)

    # Weighted reduction over the sample axis on the MXU.
    # (Default matmul precision rounds sq to bf16 before the MXU: ~1e-3
    #  relative error per product, << tolerance once summed.)
    acc_ref[...] += jnp.dot(mask, sq, preferred_element_type=jnp.float32)


def _group_sq_sums(pred, gt, dom_blocks, grp_col, *, n_rows, n_tile,
                   num_splits, inner_blocks, total_blocks, vmem_limit):
    d = pred.shape[1]
    g_pad = grp_col.shape[0]
    p = num_splits
    grid = (p, inner_blocks)
    last_block = total_blocks - 1
    mask_tail = (p * inner_blocks * n_tile) != n_rows

    def pg_index(pi, j):
        # Clamp so grid steps past the true data re-read the last block; their
        # contribution is zeroed by the in-kernel row-validity mask.
        return (jnp.minimum(pi * inner_blocks + j, last_block), 0)

    kernel = functools.partial(
        _group_sq_sum_kernel, n_rows=n_rows, n_tile=n_tile,
        inner_blocks=inner_blocks, mask_tail=mask_tail)

    flops = 2 * g_pad * n_rows * d + 4 * n_rows * d
    bytes_accessed = 4 * (2 * n_rows * d + p * inner_blocks * n_tile
                          + g_pad + p * g_pad * d)

    # TODO(synk): if DMA is still exposed at these block sizes, add
    # pipeline_mode=pl.Buffered(3) on the pred/gt specs (VMEM permitting).
    return pl.pallas_call(
        kernel,
        grid=grid,
        in_specs=[
            pl.BlockSpec((None, 1, n_tile),
                         lambda pi, j: (pi * inner_blocks + j, 0, 0)),
            pl.BlockSpec((g_pad, 1), lambda pi, j: (0, 0)),
            pl.BlockSpec((n_tile, d), pg_index),
            pl.BlockSpec((n_tile, d), pg_index),
        ],
        out_specs=pl.BlockSpec((None, g_pad, d), lambda pi, j: (pi, 0, 0)),
        out_shape=jax.ShapeDtypeStruct((p, g_pad, d), jnp.float32),
        compiler_params=pltpu.CompilerParams(
            dimension_semantics=("parallel", "arbitrary"),
            vmem_limit_bytes=int(vmem_limit),
        ),
        cost_estimate=pl.CostEstimate(
            flops=int(flops), transcendentals=0,
            bytes_accessed=int(bytes_accessed)),
    )(dom_blocks, grp_col, pred, gt)


def mean_loss(pred, gt, domain, *, n_tile=None, core_splits=None):
    """JAX/Pallas equivalent of MeanLoss.forward with base_loss = MSE(reduction='mean').

    Returns (total_loss, losses_per_group, group_loss_list); base_loss already
    reduces every group to a scalar, so both per-group results are the same
    (G,) array of per-group means.
    """
    pred = jnp.asarray(pred)
    gt = jnp.asarray(gt)
    if not jnp.issubdtype(pred.dtype, jnp.floating):
        pred = pred.astype(jnp.float32)
    if not jnp.issubdtype(gt.dtype, jnp.floating):
        gt = gt.astype(jnp.float32)

    n = pred.shape[0]
    d = int(np.prod(pred.shape[1:])) if pred.ndim > 1 else 1
    pred2 = pred.reshape(n, d)
    gt2 = gt.reshape(n, d)

    # split_into_groups(domain): data-dependent group count -> resolved on host
    # (torch.unique returns sorted uniques; np.unique matches).  Per-group
    # sample counts come for free here, so the kernel needs no count reduction.
    # TODO(synk): host-side group discovery means mean_loss is not end-to-end jittable.
    dom_np = np.asarray(jax.device_get(domain)).astype(np.int32).reshape(-1)
    uniq, counts = np.unique(dom_np, return_counts=True)
    g = int(uniq.shape[0])
    g_pad = max(_LANES, -(-g // _LANES) * _LANES)

    # Sentinel for padded dom / group slots.  Correctness does NOT depend on it
    # (tail rows are zeroed in-kernel; padded group slots are sliced away) --
    # it only keeps padded slots from aliasing a real group's accumulator.
    if int(uniq.max()) < np.iinfo(np.int32).max:
        sentinel = np.int32(int(uniq.max()) + 1)
    else:
        sentinel = np.int32(int(uniq.min()) - 1)

    grp_col = np.full((g_pad, 1), sentinel, dtype=np.int32)
    grp_col[:g, 0] = uniq

    num_splits, vmem_limit, tile_budget = _tpu_config()
    if core_splits is not None:
        num_splits = int(core_splits)

    per_split = -(-n // max(num_splits, 1))
    nt = int(n_tile) if n_tile is not None else _pick_n_tile(
        per_split, d, g_pad, tile_budget)
    total_blocks = max(1, -(-n // nt))
    p = min(num_splits, total_blocks)
    inner_blocks = -(-total_blocks // p)

    # Only the tiny domain vector is padded (with the sentinel) and laid out
    # lane-dense as (num_blocks, 1, n_tile); pred/gt stream from HBM unpadded.
    n_dom = p * inner_blocks * nt
    dom_p = np.full((n_dom,), sentinel, dtype=np.int32)
    dom_p[:n] = dom_np
    dom_blocks = jnp.asarray(dom_p.reshape(p * inner_blocks, 1, nt))

    acc = _group_sq_sums(pred2, gt2, dom_blocks, jnp.asarray(grp_col),
                         n_rows=n, n_tile=nt, num_splits=p,
                         inner_blocks=inner_blocks, total_blocks=total_blocks,
                         vmem_limit=vmem_limit)              # (p, G_pad, D) f32

    group_sq_sum = jnp.sum(acc, axis=(0, 2))[:g]             # (G,)
    group_elems = jnp.asarray(counts.astype(np.float32) * float(d))
    group_means = group_sq_sum / group_elems                 # MSE per group
    total_loss = jnp.sum(group_means) / g                    # (sum of group losses) / total_cnt
    return total_loss, group_means, group_means


if __name__ == "__main__":
    def reference(pred, gt, dom):
        pn = np.asarray(pred, dtype=np.float64)
        gn = np.asarray(gt, dtype=np.float64)
        dn = np.asarray(dom)
        means = np.array([np.mean((pn[dn == u] - gn[dn == u]) ** 2)
                          for u in np.unique(dn)])
        return float(np.sum(means) / means.shape[0]), means

    key = jax.random.PRNGKey(0)
    k1, k2, k3, k4, k5, k6 = jax.random.split(key, 6)

    # Case 1: small natural shape (N=8 samples, D=32 features, 3 domains).
    N, D = 8, 32
    pred = jax.random.normal(k1, (N, D), dtype=jnp.float32)
    gt = jax.random.normal(k2, (N, D), dtype=jnp.float32)
    domain = jax.random.randint(k3, (N,), 0, 3, dtype=jnp.int32)

    total, per_group, group_list = mean_loss(pred, gt, domain)
    jax.block_until_ready(total)
    jax.block_until_ready(per_group)
    ref_total, ref_means = reference(pred, gt, domain)
    assert np.allclose(float(total), ref_total, rtol=1e-3, atol=1e-3), (
        float(total), ref_total)
    assert np.allclose(np.asarray(per_group), ref_means, rtol=1e-3, atol=1e-3), (
        np.asarray(per_group), ref_means)
    assert np.allclose(np.asarray(group_list), ref_means, rtol=1e-3, atol=1e-3)

    # Case 2: multi-tile path with a ragged tail and a forced 2-way core split
    # (exercises in-kernel tail masking + the clamped pred/gt index_map).
    N2, D2 = 700, 32
    pred_b = jax.random.normal(k4, (N2, D2), dtype=jnp.float32)
    gt_b = jax.random.normal(k5, (N2, D2), dtype=jnp.float32)
    domain_b = jax.random.randint(k6, (N2,), 0, 5, dtype=jnp.int32)

    total_b, per_group_b, _ = mean_loss(pred_b, gt_b, domain_b,
                                        n_tile=256, core_splits=2)
    jax.block_until_ready(total_b)
    ref_total_b, ref_means_b = reference(pred_b, gt_b, domain_b)
    assert np.allclose(float(total_b), ref_total_b, rtol=1e-3, atol=1e-3), (
        float(total_b), ref_total_b)
    assert np.allclose(np.asarray(per_group_b), ref_means_b, rtol=1e-3, atol=1e-3), (
        np.asarray(per_group_b), ref_means_b)

    print("KERNEL_OK")
</pallas_src>

<mosaic_0001>
module attributes {stable_mosaic.version = 11 : i64} {
  func.func @_group_sq_sum_kernel(%arg0: i32, %arg1: i32, %arg2: memref<1x1x8xi32, #tpu.memory_space<vmem>>, %arg3: memref<128x1xi32, #tpu.memory_space<vmem>>, %arg4: memref<8x32xf32, #tpu.memory_space<vmem>>, %arg5: memref<8x32xf32, #tpu.memory_space<vmem>>, %arg6: memref<1x128x32xf32, #tpu.memory_space<vmem>>) attributes {dimension_semantics = [#tpu.dimension_semantics<parallel>, #tpu.dimension_semantics<arbitrary>], iteration_bounds = array<i64: 1, 1>, scalar_prefetch = 0 : i64, scratch_operands = 0 : i64, tpu.core_type = #tpu.core_type<tc>, window_params = [{transform_indices = @transform_0, window_bounds = array<i64: 1, 1, 8>}, {pipeline_mode = #tpu.pipeline_mode<synchronous>, transform_indices = @transform_1, window_bounds = array<i64: 128, 1>}, {transform_indices = @transform_2, window_bounds = array<i64: 8, 32>}, {transform_indices = @transform_3, window_bounds = array<i64: 8, 32>}, {transform_indices = @transform_4, window_bounds = array<i64: 1, 128, 32>}]} {
    %c0_i32 = arith.constant 0 : i32
    %0 = arith.cmpi eq, %arg1, %c0_i32 : i32
    %1 = arith.extui %0 : i1 to i32
    %c0_i32_0 = arith.constant 0 : i32
    %2 = arith.cmpi ne, %1, %c0_i32_0 : i32
    scf.if %2 {
      %cst_17 = arith.constant 0.000000e+00 : f32
      %23 = vector.broadcast %cst_17 : f32 to vector<128x32xf32>
      %c0_18 = arith.constant 0 : index
      %c0_19 = arith.constant 0 : index
      %c0_20 = arith.constant 0 : index
      %24 = vector.load %arg6[%c0_18, %c0_19, %c0_20] : memref<1x128x32xf32, #tpu.memory_space<vmem>>, vector<1x128x32xf32>
      %25 = vector.shape_cast %24 : vector<1x128x32xf32> to vector<128x32xf32>
      %26 = vector.shape_cast %23 : vector<128x32xf32> to vector<1x128x32xf32>
      tpu.vector_store %arg6[%c0_18, %c0_19, %c0_20], %26 {strides = array<i32>} : memref<1x128x32xf32, #tpu.memory_space<vmem>>, vector<1x128x32xf32>,
    } else {
    }
    %c0 = arith.constant 0 : index
    %c0_1 = arith.constant 0 : index
    %3 = vector.load %arg4[%c0, %c0_1] : memref<8x32xf32, #tpu.memory_space<vmem>>, vector<8x32xf32>
    %c0_2 = arith.constant 0 : index
    %c0_3 = arith.constant 0 : index
    %4 = vector.load %arg5[%c0_2, %c0_3] : memref<8x32xf32, #tpu.memory_space<vmem>>, vector<8x32xf32>
    %5 = arith.subf %3, %4 : vector<8x32xf32>
    %6 = arith.mulf %5, %5 : vector<8x32xf32>
    %c0_4 = arith.constant 0 : index
    %c0_5 = arith.constant 0 : index
    %7 = vector.load %arg3[%c0_4, %c0_5] : memref<128x1xi32, #tpu.memory_space<vmem>>, vector<128x1xi32>
    %c0_6 = arith.constant 0 : index
    %c0_7 = arith.constant 0 : index
    %c0_8 = arith.constant 0 : index
    %8 = vector.load %arg2[%c0_6, %c0_7, %c0_8] : memref<1x1x8xi32, #tpu.memory_space<vmem>>, vector<1x1x8xi32>
    %9 = vector.shape_cast %8 : vector<1x1x8xi32> to vector<1x8xi32>
    %10 = vector.broadcast %7 : vector<128x1xi32> to vector<128x8xi32>
    %11 = vector.broadcast %9 : vector<1x8xi32> to vector<128x8xi32>
    %12 = arith.cmpi eq, %10, %11 : vector<128x8xi32>
    %cst = arith.constant 1.000000e+00 : f32
    %cst_9 = arith.constant 0.000000e+00 : f32
    %13 = vector.broadcast %cst : f32 to vector<128x8xf32>
    %14 = vector.broadcast %cst_9 : f32 to vector<128x8xf32>
    %15 = arith.select %12, %13, %14 : vector<128x8xi1>, vector<128x8xf32>
    %c0_10 = arith.constant 0 : index
    %c0_11 = arith.constant 0 : index
    %c0_12 = arith.constant 0 : index
    %16 = vector.load %arg6[%c0_10, %c0_11, %c0_12] : memref<1x128x32xf32, #tpu.memory_space<vmem>>, vector<1x128x32xf32>
    %17 = vector.shape_cast %16 : vector<1x128x32xf32> to vector<128x32xf32>
    %cst_13 = arith.constant dense<0.000000e+00> : vector<128x32xf32>
    %18 = tpu.matmul %15, %6, %cst_13 {dimension_numbers = #tpu.dot_dimension_numbers<[1], [0], [0], [1], [0, 0, 1, 1], [], []>} : vector<128x8xf32>, vector<8x32xf32>, vector<128x32xf32> -> vector<128x32xf32>
    %19 = arith.addf %17, %18 : vector<128x32xf32>
    %c0_14 = arith.constant 0 : index
    %c0_15 = arith.constant 0 : index
    %c0_16 = arith.constant 0 : index
    %20 = vector.load %arg6[%c0_14, %c0_15, %c0_16] : memref<1x128x32xf32, #tpu.memory_space<vmem>>, vector<1x128x32xf32>
    %21 = vector.shape_cast %20 : vector<1x128x32xf32> to vector<128x32xf32>
    %22 = vector.shape_cast %19 : vector<128x32xf32> to vector<1x128x32xf32>
    tpu.vector_store %arg6[%c0_14, %c0_15, %c0_16], %22 {strides = array<i32>} : memref<1x128x32xf32, #tpu.memory_space<vmem>>, vector<1x128x32xf32>,
    return
  }
  func.func @transform_0(%arg0: i32, %arg1: i32) -> (i32, i32, i32) {
    %c1_i32 = arith.constant 1 : i32
    %0 = arith.muli %arg0, %c1_i32 : i32
    %1 = arith.addi %0, %arg1 : i32
    %c0_i32 = arith.constant 0 : i32
    %c0_i32_0 = arith.constant 0 : i32
    %c0_i32_1 = arith.constant 0 : i32
    return %1, %c0_i32, %c0_i32_0 : i32, i32, i32
  }
  func.func @transform_1(%arg0: i32, %arg1: i32) -> (i32, i32) {
    %c0_i32 = arith.constant 0 : i32
    %c0_i32_0 = arith.constant 0 : i32
    %c0_i32_1 = arith.constant 0 : i32
    return %c0_i32, %c0_i32_0 : i32, i32
  }
  func.func @transform_2(%arg0: i32, %arg1: i32) -> (i32, i32) {
    %c1_i32 = arith.constant 1 : i32
    %0 = arith.muli %arg0, %c1_i32 : i32
    %1 = arith.addi %0, %arg1 : i32
    %c0_i32 = arith.constant 0 : i32
    %2 = arith.minsi %1, %c0_i32 : i32
    %c0_i32_0 = arith.constant 0 : i32
    %c0_i32_1 = arith.constant 0 : i32
    return %2, %c0_i32_0 : i32, i32
  }
  func.func @transform_3(%arg0: i32, %arg1: i32) -> (i32, i32) {
    %c1_i32 = arith.constant 1 : i32
    %0 = arith.muli %arg0, %c1_i32 : i32
    %1 = arith.addi %0, %arg1 : i32
    %c0_i32 = arith.constant 0 : i32
    %2 = arith.minsi %1, %c0_i32 : i32
    %c0_i32_0 = arith.constant 0 : i32
    %c0_i32_1 = arith.constant 0 : i32
    return %2, %c0_i32_0 : i32, i32
  }
  func.func @transform_4(%arg0: i32, %arg1: i32) -> (i32, i32, i32) {
    %c0_i32 = arith.constant 0 : i32
    %c0_i32_0 = arith.constant 0 : i32
    %c0_i32_1 = arith.constant 0 : i32
    return %arg0, %c0_i32, %c0_i32_0 : i32, i32, i32
  }
}

</mosaic_0001>

<bundles_post_ra>
// kernel: tpu_custom_call.1
= control target key start
LH: loop header
LB: loop body
LE: loop exit
PB: predicated region body
PF: predicated region fallthrough
CT: control target
= control target key end

     0   :  { %v539_v0 = vmov 0   ;;  %vm89_vm0 = vcmask 261120   ;;  %v540_v21 = vmov 0.0   ;;  %vm227_vm1 = vcmask 64512   ;;  %s865_s1 = inlined_call_operand.vmem [shape: s32[128,1], index: 1, kind: input, shape index: {}]   ;;  %s866_s2 = inlined_call_operand.vmem [shape: f32[8,32], index: 2, kind: input, shape index: {}]   ;;  %s867_s3 = inlined_call_operand.vmem [shape: f32[8,32], index: 3, kind: input, shape index: {}]   ;;  %s868_s4 = inlined_call_operand.vmem [shape: f32[1,128,32], index: 4, kind: output, shape index: {}]   ;;  %s869_s0 = inlined_call_operand.vmem [shape: s32[1,1,8], index: 0, kind: input, shape index: {}]  }
   0x1   :  { %538 = vset.pattern.permute.xlu1 %v539_v0  ;;  %537 = vset.pattern.permute.xlu0 %v539_v0  ;;  %v111_v1 = vld [vmem:[%s865_s1 + $0x8] sm:$0xff]  ;;  %v110_v2 = vld [vmem:[%s865_s1] sm:$0xff]  ;;  %v120_v6 = vld [vmem:[%s865_s1 + $0x50] sm:$0xff]  ;;  %91 = vst.msk [vmem:[%s868_s4 + $0x8] sm:$0xff] %vm89_vm0, %v540_v21 }
   0x2   :  { %131 = vperm.xlu1 %538, %v111_v1   ;;  %128 = vperm.xlu0 %537, %v110_v2   ;;  %v119_v3 = vld [vmem:[%s865_s1 + $0x48] sm:$0xff]  ;;  %v118_v4 = vld [vmem:[%s865_s1 + $0x40] sm:$0xff]  ;;  %v112_v7 = vld [vmem:[%s865_s1 + $0x10] sm:$0xff]  ;;  %90 = vst.msk [vmem:[%s868_s4] sm:$0xff] %vm89_vm0, %v540_v21 }
   0x3   :  { %v106_v5 = vld [vmem:[%s866_s2] sm:$0xff]  ;;  %v121_v11 = vld [vmem:[%s865_s1 + $0x58] sm:$0xff]  ;;  %v123_v15 = vld [vmem:[%s865_s1 + $0x68] sm:$0xff]  ;;  %92 = vst.msk [vmem:[%s868_s4 + $0x10] sm:$0xff] %vm89_vm0, %v540_v21 }
   0x4   :  { %v107_v8 = vld [vmem:[%s867_s3] sm:$0xff]  ;;  %v113_v12 = vld [vmem:[%s865_s1 + $0x18] sm:$0xff]  ;;  %v115_v16 = vld [vmem:[%s865_s1 + $0x28] sm:$0xff]  ;;  %93 = vst.msk [vmem:[%s868_s4 + $0x18] sm:$0xff] %vm89_vm0, %v540_v21 }
   0x5   :  { %v108_v9 = vsub.f32 %v106_v5, %v107_v8  ;;  %v122_v13 = vld [vmem:[%s865_s1 + $0x60] sm:$0xff]  ;;  %v124_v17 = vld [vmem:[%s865_s1 + $0x70] sm:$0xff]  ;;  %v125_v19 = vld [vmem:[%s865_s1 + $0x78] sm:$0xff]  ;;  %94 = vst.msk [vmem:[%s868_s4 + $0x20] sm:$0xff] %vm89_vm0, %v540_v21 }
   0x6   :  { %155 = vperm.xlu1 %538, %v119_v3   ;;  %152 = vperm.xlu0 %537, %v118_v4   ;;  %v114_v14 = vld [vmem:[%s865_s1 + $0x20] sm:$0xff]  ;;  %v116_v18 = vld [vmem:[%s865_s1 + $0x30] sm:$0xff]  ;;  %v117_v20 = vld [vmem:[%s865_s1 + $0x38] sm:$0xff]  ;;  %95 = vst.msk [vmem:[%s868_s4 + $0x28] sm:$0xff] %vm89_vm0, %v540_v21 }
   0x7   :  { %v109_v10 = vmul.f32 %v108_v9, %v108_v9  ;;  %96 = vst.msk [vmem:[%s868_s4 + $0x30] sm:$0xff] %vm89_vm0, %v540_v21  ;;  %97 = vst.msk [vmem:[%s868_s4 + $0x38] sm:$0xff] %vm89_vm0, %v540_v21  ;;  %v703_v22 = vld [vmem:[%s869_s0] ss:$0 sm:$0xff] }
   0x8   :  { %98 = vst.msk [vmem:[%s868_s4 + $0x40] sm:$0xff] %vm89_vm0, %v540_v21  ;;  %99 = vst.msk [vmem:[%s868_s4 + $0x48] sm:$0xff] %vm89_vm0, %v540_v21  ;;  %v212_v55 = vld [vmem:[%s868_s4 + $0x8] sm:$0xff] }
   0x9   :  { %507 = vmatprep.subr.mxu0 %v109_v10  ;;  %533 = vmatprep.subr.mxu1 %v109_v10  ;;  %100 = vst.msk [vmem:[%s868_s4 + $0x50] sm:$0xff] %vm89_vm0, %v540_v21  ;;  %101 = vst.msk [vmem:[%s868_s4 + $0x58] sm:$0xff] %vm89_vm0, %v540_v21  ;;  %v211_v57 = vld [vmem:[%s868_s4] sm:$0xff] }
   0xa   :  { %158 = vperm.xlu1 %538, %v120_v6   ;;  %134 = vperm.xlu0 %537, %v112_v7   ;;  %102 = vst.msk [vmem:[%s868_s4 + $0x60] sm:$0xff] %vm89_vm0, %v540_v21  ;;  %103 = vst.msk [vmem:[%s868_s4 + $0x68] sm:$0xff] %vm89_vm0, %v540_v21  ;;  %v213_v7 = vld [vmem:[%s868_s4 + $0x10] sm:$0xff] }
   0xb   :  { %508 = vmatpush3.msra.mxu0 %v109_v10  ;;  %534 = vmatpush3.msra.mxu1 %v109_v10  ;;  %104 = vst.msk [vmem:[%s868_s4 + $0x70] sm:$0xff] %vm89_vm0, %v540_v21  ;;  %105 = vst.msk [vmem:[%s868_s4 + $0x78] sm:$0xff] %vm89_vm0, %v540_v21  ;;  %v214_v3 = vld [vmem:[%s868_s4 + $0x18] sm:$0xff] }
   0xe   :  { %161 = vperm.xlu1 %538, %v121_v11   ;;  %137 = vperm.xlu0 %537, %v113_v12  }
   0xf   :  { %v220_v60 = vld [vmem:[%s868_s4 + $0x48] sm:$0xff]  ;;  %v219_v63 = vld [vmem:[%s868_s4 + $0x40] sm:$0xff] }
  0x10   :  { %v222_v4 = vld [vmem:[%s868_s4 + $0x58] sm:$0xff]  ;;  %v221_v8 = vld [vmem:[%s868_s4 + $0x50] sm:$0xff] }
  0x12   :  { %164 = vperm.xlu1 %538, %v122_v13   ;;  %140 = vperm.xlu0 %537, %v114_v14  }
  0x16   :  { %167 = vperm.xlu1 %538, %v123_v15   ;;  %143 = vperm.xlu0 %537, %v115_v16   ;;  %v216_v15 = vld [vmem:[%s868_s4 + $0x28] sm:$0xff] }
  0x17   :  { %v224_v16 = vld [vmem:[%s868_s4 + $0x68] sm:$0xff] }
  0x1a   :  { %170 = vperm.xlu1 %538, %v124_v17   ;;  %146 = vperm.xlu0 %537, %v116_v18  }
  0x1e   :  { %173 = vperm.xlu1 %538, %v125_v19   ;;  %149 = vperm.xlu0 %537, %v117_v20   ;;  %v215_v19 = vld [vmem:[%s868_s4 + $0x20] sm:$0xff] }
  0x1f   :  { %v223_v20 = vld [vmem:[%s868_s4 + $0x60] sm:$0xff] }
  0x7d   :  { %v132_v23 = vpop.permute.xlu1 %131  ;;  %v129_v24 = vpop.permute.xlu0 %128 }
  0x7e   :  { %vm180_vm2 = vcmp.eq.s32.totalorder %v132_v23, %v703_v22  ;;  %vm179_vm3 = vcmp.eq.s32.totalorder %v129_v24, %v703_v22 }
  0x7f   :  { %v196_v25 = vsel %vm180_vm2, 1.0, %v540_v21  ;;  %v195_v26 = vsel %vm179_vm3, 1.0, %v540_v21 }
  0x80   :  { %509 = vmatprep.mubr.msk.f32.mxu0 %vm227_vm1, %v195_v26 }
  0x81   :  { %v156_v27 = vpop.permute.xlu1 %155  ;;  %v153_v28 = vpop.permute.xlu0 %152  ;;  %510 = vmatmul.mubr.msk.f32.vlgmr.msra.gmra.mxu0 %vm227_vm1, %v196_v25 }
  0x82   :  { %vm188_vm4 = vcmp.eq.s32.totalorder %v156_v27, %v703_v22  ;;  %vm187_vm5 = vcmp.eq.s32.totalorder %v153_v28, %v703_v22  ;;  %v218_v27 = vld [vmem:[%s868_s4 + $0x38] sm:$0xff] }
  0x83   :  { %v204_v29 = vsel %vm188_vm4, 1.0, %v540_v21  ;;  %v203_v30 = vsel %vm187_vm5, 1.0, %v540_v21  ;;  %v226_v28 = vld [vmem:[%s868_s4 + $0x78] sm:$0xff] }
  0x84   :  { %521 = vmatprep.mubr.msk.f32.mxu1 %vm227_vm1, %v203_v30 }
  0x85   :  { %v159_v31 = vpop.permute.xlu1 %158  ;;  %v135_v32 = vpop.permute.xlu0 %134  ;;  %522 = vmatmul.mubr.msk.f32.vlgmr.msra.gmra.mxu1 %vm227_vm1, %v204_v29 }
  0x86   :  { %vm189_vm6 = vcmp.eq.s32.totalorder %v159_v31, %v703_v22  ;;  %vm181_vm7 = vcmp.eq.s32.totalorder %v135_v32, %v703_v22  ;;  %v217_v31 = vld [vmem:[%s868_s4 + $0x30] sm:$0xff] }
  0x87   :  { %v205_v33 = vsel %vm189_vm6, 1.0, %v540_v21  ;;  %v197_v34 = vsel %vm181_vm7, 1.0, %v540_v21  ;;  %v225_v32 = vld [vmem:[%s868_s4 + $0x70] sm:$0xff] }
  0x88   :  { %512 = vmatprep.mubr.msk.f32.mxu0 %vm227_vm1, %v197_v34  ;;  %524 = vmatprep.mubr.msk.f32.mxu1 %vm227_vm1, %v205_v33 }
  0x89   :  { %v162_v35 = vpop.permute.xlu1 %161  ;;  %v138_v36 = vpop.permute.xlu0 %137 }
  0x8a   :  { %vm190_vm8 = vcmp.eq.s32.totalorder %v162_v35, %v703_v22  ;;  %vm182_vm9 = vcmp.eq.s32.totalorder %v138_v36, %v703_v22 }
  0x8b   :  { %v206_v37 = vsel %vm190_vm8, 1.0, %v540_v21  ;;  %v198_v38 = vsel %vm182_vm9, 1.0, %v540_v21 }
  0x8c   :  { %513 = vmatmul.mubr.msk.f32.gmra.mxu0 %vm227_vm1, %v198_v38  ;;  %525 = vmatmul.mubr.msk.f32.gmra.mxu1 %vm227_vm1, %v206_v37 }
  0x8d   :  { %v165_v39 = vpop.permute.xlu1 %164  ;;  %v141_v40 = vpop.permute.xlu0 %140 }
  0x8e   :  { %vm191_vm10 = vcmp.eq.s32.totalorder %v165_v39, %v703_v22  ;;  %vm183_vm11 = vcmp.eq.s32.totalorder %v141_v40, %v703_v22 }
  0x8f   :  { %v207_v41 = vsel %vm191_vm10, 1.0, %v540_v21  ;;  %v199_v42 = vsel %vm183_vm11, 1.0, %v540_v21 }
  0x90   :  { %515 = vmatprep.mubr.msk.f32.mxu0 %vm227_vm1, %v199_v42  ;;  %527 = vmatprep.mubr.msk.f32.mxu1 %vm227_vm1, %v207_v41 }
  0x91   :  { %v168_v43 = vpop.permute.xlu1 %167  ;;  %v144_v44 = vpop.permute.xlu0 %143 }
  0x92   :  { %vm192_vm12 = vcmp.eq.s32.totalorder %v168_v43, %v703_v22  ;;  %vm184_vm13 = vcmp.eq.s32.totalorder %v144_v44, %v703_v22 }
  0x93   :  { %v208_v45 = vsel %vm192_vm12, 1.0, %v540_v21  ;;  %v200_v46 = vsel %vm184_vm13, 1.0, %v540_v21 }
  0x94   :  { %516 = vmatmul.mubr.msk.f32.gmra.mxu0 %vm227_vm1, %v200_v46  ;;  %528 = vmatmul.mubr.msk.f32.gmra.mxu1 %vm227_vm1, %v208_v45 }
  0x95   :  { %v171_v47 = vpop.permute.xlu1 %170  ;;  %v147_v48 = vpop.permute.xlu0 %146 }
  0x96   :  { %vm193_vm14 = vcmp.eq.s32.totalorder %v171_v47, %v703_v22  ;;  %vm185_vm15 = vcmp.eq.s32.totalorder %v147_v48, %v703_v22 }
  0x97   :  { %v209_v49 = vsel %vm193_vm14, 1.0, %v540_v21  ;;  %v201_v50 = vsel %vm185_vm15, 1.0, %v540_v21 }
  0x98   :  { %518 = vmatprep.mubr.msk.f32.mxu0 %vm227_vm1, %v201_v50  ;;  %530 = vmatprep.mubr.msk.f32.mxu1 %vm227_vm1, %v209_v49 }
  0x99   :  { %v174_v51 = vpop.permute.xlu1 %173  ;;  %v150_v52 = vpop.permute.xlu0 %149 }
  0x9a   :  { %vm194_vm2 = vcmp.eq.s32.totalorder %v174_v51, %v703_v22  ;;  %vm186_vm3 = vcmp.eq.s32.totalorder %v150_v52, %v703_v22 }
  0x9b   :  { %v210_v53 = vsel %vm194_vm2, 1.0, %v540_v21  ;;  %v202_v54 = vsel %vm186_vm3, 1.0, %v540_v21 }
  0x9c   :  { %519 = vmatmul.mubr.msk.f32.gmra.mxu0 %vm227_vm1, %v202_v54  ;;  %531 = vmatmul.mubr.msk.f32.gmra.mxu1 %vm227_vm1, %v210_v53 }
 0x141   :  { %v511_v56 = vpop.f32.mrf.mxu0 }
 0x142   :  { %v422_v58 = vadd.f32 %v511_v56, %v212_v55 }
 0x143   :  { %v342_v59 = vpop.f32.mrf.mxu0 }
 0x144   :  { %439 = vst.msk [vmem:[%s868_s4 + $0x8] sm:$0xff] %vm89_vm0, %v422_v58  ;;  %v421_v61 = vadd.f32 %v342_v59, %v211_v57 }
 0x145   :  { %v523_v62 = vpop.f32.mrf.mxu1 }
 0x146   :  { %438 = vst.msk [vmem:[%s868_s4] sm:$0xff] %vm89_vm0, %v421_v61  ;;  %v430_v0 = vadd.f32 %v523_v62, %v220_v60 }
 0x147   :  { %v382_v1 = vpop.f32.mrf.mxu1 }
 0x148   :  { %447 = vst.msk [vmem:[%s868_s4 + $0x48] sm:$0xff] %vm89_vm0, %v430_v0  ;;  %v429_v2 = vadd.f32 %v382_v1, %v219_v63 }
 0x14a   :  { %446 = vst.msk [vmem:[%s868_s4 + $0x40] sm:$0xff] %vm89_vm0, %v429_v2 }
 0x14c   :  { %v514_v5 = vpop.f32.mrf.mxu0  ;;  %v526_v6 = vpop.f32.mrf.mxu1 }
 0x14d   :  { %v424_v9 = vadd.f32 %v514_v5, %v214_v3  ;;  %v432_v10 = vadd.f32 %v526_v6, %v222_v4 }
 0x14e   :  { %v352_v11 = vpop.f32.mrf.mxu0  ;;  %v392_v12 = vpop.f32.mrf.mxu1 }
 0x14f   :  { %441 = vst.msk [vmem:[%s868_s4 + $0x18] sm:$0xff] %vm89_vm0, %v424_v9  ;;  %449 = vst.msk [vmem:[%s868_s4 + $0x58] sm:$0xff] %vm89_vm0, %v432_v10  ;;  %v423_v13 = vadd.f32 %v352_v11, %v213_v7  ;;  %v431_v14 = vadd.f32 %v392_v12, %v221_v8 }
 0x151   :  { %440 = vst.msk [vmem:[%s868_s4 + $0x10] sm:$0xff] %vm89_vm0, %v423_v13  ;;  %448 = vst.msk [vmem:[%s868_s4 + $0x50] sm:$0xff] %vm89_vm0, %v431_v14 }
 0x154   :  { %v517_v17 = vpop.f32.mrf.mxu0  ;;  %v529_v18 = vpop.f32.mrf.mxu1 }
 0x155   :  { %v426_v21 = vadd.f32 %v517_v17, %v216_v15  ;;  %v434_v22 = vadd.f32 %v529_v18, %v224_v16 }
 0x156   :  { %v362_v23 = vpop.f32.mrf.mxu0  ;;  %v402_v24 = vpop.f32.mrf.mxu1 }
 0x157   :  { %443 = vst.msk [vmem:[%s868_s4 + $0x28] sm:$0xff] %vm89_vm0, %v426_v21  ;;  %451 = vst.msk [vmem:[%s868_s4 + $0x68] sm:$0xff] %vm89_vm0, %v434_v22  ;;  %v425_v25 = vadd.f32 %v362_v23, %v215_v19  ;;  %v433_v26 = vadd.f32 %v402_v24, %v223_v20 }
 0x159   :  { %442 = vst.msk [vmem:[%s868_s4 + $0x20] sm:$0xff] %vm89_vm0, %v425_v25  ;;  %450 = vst.msk [vmem:[%s868_s4 + $0x60] sm:$0xff] %vm89_vm0, %v433_v26 }
 0x15c   :  { %v520_v29 = vpop.f32.mrf.mxu0  ;;  %v532_v30 = vpop.f32.mrf.mxu1 }
 0x15d   :  { %v428_v33 = vadd.f32 %v520_v29, %v218_v27  ;;  %v436_v34 = vadd.f32 %v532_v30, %v226_v28 }
 0x15e   :  { %v372_v35 = vpop.f32.mrf.mxu0  ;;  %v412_v36 = vpop.f32.mrf.mxu1 }
 0x15f   :  { %445 = vst.msk [vmem:[%s868_s4 + $0x38] sm:$0xff] %vm89_vm0, %v428_v33  ;;  %453 = vst.msk [vmem:[%s868_s4 + $0x78] sm:$0xff] %vm89_vm0, %v436_v34  ;;  %v427_v37 = vadd.f32 %v372_v35, %v217_v31  ;;  %v435_v38 = vadd.f32 %v412_v36, %v225_v32 }
 0x161   :  { %444 = vst.msk [vmem:[%s868_s4 + $0x30] sm:$0xff] %vm89_vm0, %v427_v37  ;;  %452 = vst.msk [vmem:[%s868_s4 + $0x70] sm:$0xff] %vm89_vm0, %v435_v38 }

</bundles_post_ra>
